<compile_context>
chip_gen: v5e
topology: v5e:2x2
jax: 0.10.0
libtpu: 0.0.40
codegen_flags: <defaults>
</compile_context>

<pallas_src>
import functools

import jax
import jax.numpy as jnp
from jax.experimental import pallas as pl
from jax.experimental.pallas import tpu as pltpu


def temporal_policy_kernel(x_ref, w1_ref, b_ref, w2_ref, w3_ref, out_ref, *,
                           T, TB, inv_temp):
    M = TB * T
    x = x_ref[...]                                        # (M, C) f32, rows = (seq, time)

    # Sequence-boundary masks, hoisted once and reused by both temporal convs.
    t_idx = jax.lax.broadcasted_iota(jnp.int32, (TB, T, 1), 1)
    keep_prev = (t_idx > 0).astype(jnp.float32).reshape(M, 1)      # zero "prev" at t == 0
    keep_next = (t_idx < T - 1).astype(jnp.float32).reshape(M, 1)  # zero "next" at t == T-1

    def taps(v):
        # Zero-padded temporal shifts (conv padding=(1,0)) with per-sequence masking,
        # concatenated so each conv is a single fused matmul.
        prev = jnp.roll(v, 1, axis=0) * keep_prev
        nxt = jnp.roll(v, -1, axis=0) * keep_next
        return jnp.concatenate([prev, v, nxt], axis=-1)   # (M, 3*F)

    # Conv1: Conv2d(C -> H, kernel (3,1), pad (1,0), no bias) with BN1 folded in, + ReLU.
    h1 = jnp.dot(taps(x), w1_ref[...], preferred_element_type=jnp.float32)
    h1 = jnp.maximum(h1 + b_ref[0:1, :], 0.0)

    # Conv2: Conv2d(H -> H, kernel (3,1), pad (1,0), no bias) with BN2 folded in, + ReLU.
    h2 = jnp.dot(taps(h1), w2_ref[...], preferred_element_type=jnp.float32)
    h2 = jnp.maximum(h2 + b_ref[1:2, :], 0.0)

    # Conv3: Conv2d(H -> 1, kernel (1,1), no bias) -> per-frame logit, regrouped per sequence.
    logits = jnp.dot(h2, w3_ref[...], preferred_element_type=jnp.float32)    # (M, 1)
    logits = logits.reshape(TB, T, 1)

    # Stabilized softmax over the temporal axis, shared between both temperatures.
    z = logits - jnp.max(logits, axis=1, keepdims=True)
    e1 = jnp.exp(z)
    x1 = e1 / jnp.sum(e1, axis=1, keepdims=True)
    e2 = jnp.exp(z * inv_temp)
    x2 = e2 / jnp.sum(e2, axis=1, keepdims=True)

    out_ref[...] = jnp.concatenate([x1, x2], axis=-1)     # (TB, T, 2), single store


def temporal_policy_forward(x, params, num_glance_segments, temperature):
    """x: (N, input_dim) with N a multiple of num_glance_segments (like the PyTorch
    forward's x.reshape(-1, T, C)).  Returns (x1, x2), each of shape (B, T)."""
    T = num_glance_segments
    H, C, _, _ = params["w1"].shape                       # torch conv weight (H, C, 3, 1)
    N = x.shape[0]
    assert N % T == 0
    B = N // T

    eps = 1e-5
    # Fold eval-mode BatchNorm into per-channel scale (into the conv weights) + bias.
    s1 = params["bn1_gamma"] * jax.lax.rsqrt(params["bn1_var"] + eps)
    b1 = params["bn1_beta"] - params["bn1_mean"] * s1
    s2 = params["bn2_gamma"] * jax.lax.rsqrt(params["bn2_var"] + eps)
    b2 = params["bn2_beta"] - params["bn2_mean"] * s2
    # TODO(synk): training-mode BatchNorm (batch statistics) is not implemented.

    # (out, in, 3, 1) conv weights -> tap-major fused matrices (3*in, out), BN scale folded.
    w1t = jnp.transpose(params["w1"][:, :, :, 0], (2, 1, 0))   # (3, C, H); tap0 = t-1
    w2t = jnp.transpose(params["w2"][:, :, :, 0], (2, 1, 0))   # (3, H, H)
    w1f = (w1t.reshape(3 * C, H) * s1[None, :]).astype(jnp.float32)
    w2f = (w2t.reshape(3 * H, H) * s2[None, :]).astype(jnp.float32)
    bvec = jnp.stack([b1, b2], axis=0).astype(jnp.float32)     # (2, H)
    w3 = params["w3"][:, :, 0, 0].T.astype(jnp.float32)        # (H, 1)

    # Batch tiling: TB sequences per grid step -> matmul M dim = TB*T.  At TB=256,
    # M=2048 (multiple of 256 for v6e/v7x MXU, 128 for v5e); larger B gives >=2 grid
    # steps so both v7x TensorCores get work.  Small B runs as one full-array tile.
    TB_MAX = 256
    if B <= TB_MAX:
        TB, Bp = B, B
    else:
        TB = TB_MAX
        Bp = pl.cdiv(B, TB) * TB
    grid = Bp // TB

    xb = x.reshape(B, T, C).astype(jnp.float32)
    if Bp != B:
        xb = jnp.pad(xb, ((0, Bp - B), (0, 0), (0, 0)))
    x2d = xb.reshape(Bp * T, C)

    kernel = functools.partial(temporal_policy_kernel, T=T, TB=TB,
                               inv_temp=1.0 / float(temperature))

    out = pl.pallas_call(
        kernel,
        out_shape=jax.ShapeDtypeStruct((Bp, T, 2), jnp.float32),
        grid_spec=pltpu.PrefetchScalarGridSpec(
            num_scalar_prefetch=0,
            grid=(grid,),
            in_specs=[
                pl.BlockSpec((TB * T, C), lambda i: (i, 0)),   # activations for TB sequences
                pl.BlockSpec((3 * C, H), lambda i: (0, 0)),    # conv1 taps fused, BN1 folded
                pl.BlockSpec((2, H), lambda i: (0, 0)),        # bn1/bn2 biases packed
                pl.BlockSpec((3 * H, H), lambda i: (0, 0)),    # conv2 taps fused, BN2 folded
                pl.BlockSpec((H, 1), lambda i: (0, 0)),        # conv3 1x1
            ],
            out_specs=pl.BlockSpec((TB, T, 2), lambda i: (i, 0, 0)),
        ),
        compiler_params=pltpu.CompilerParams(dimension_semantics=("parallel",)),
    )(x2d, w1f, bvec, w2f, w3)

    out = out[:B]
    return out[:, :, 0], out[:, :, 1]


def _ref_forward(x, params, num_glance_segments, temperature):
    """Pure-JAX reference (same math, no Pallas) for a correctness check."""
    T = num_glance_segments
    H, C, _, _ = params["w1"].shape
    xb = x.reshape(-1, T, C).astype(jnp.float32)
    eps = 1e-5
    s1 = params["bn1_gamma"] / jnp.sqrt(params["bn1_var"] + eps)
    b1 = params["bn1_beta"] - params["bn1_mean"] * s1
    s2 = params["bn2_gamma"] / jnp.sqrt(params["bn2_var"] + eps)
    b2 = params["bn2_beta"] - params["bn2_mean"] * s2
    w1k = jnp.transpose(params["w1"][:, :, :, 0], (2, 1, 0))
    w2k = jnp.transpose(params["w2"][:, :, :, 0], (2, 1, 0))
    w3 = params["w3"][:, :, 0, 0].T

    def conv_t(v, wk):
        vp = jnp.pad(v, ((0, 0), (1, 0), (0, 0)))[:, :T]
        vn = jnp.pad(v, ((0, 0), (0, 1), (0, 0)))[:, 1:]
        return vp @ wk[0] + v @ wk[1] + vn @ wk[2]

    h1 = jnp.maximum(conv_t(xb, w1k) * s1 + b1, 0.0)
    h2 = jnp.maximum(conv_t(h1, w2k) * s2 + b2, 0.0)
    logits = (h2 @ w3)[..., 0]
    return jax.nn.softmax(logits, axis=1), jax.nn.softmax(logits / temperature, axis=1)


if __name__ == "__main__":
    # Small, module-consistent sizes.
    input_dim = 16
    hidden_dim = 32
    num_glance_segments = 8
    temperature = 4.0
    batch = 2

    key = jax.random.PRNGKey(0)
    keys = jax.random.split(key, 10)

    params = {
        "w1": 0.1 * jax.random.normal(keys[0], (hidden_dim, input_dim, 3, 1), jnp.float32),
        "w2": 0.1 * jax.random.normal(keys[1], (hidden_dim, hidden_dim, 3, 1), jnp.float32),
        "w3": 0.1 * jax.random.normal(keys[2], (1, hidden_dim, 1, 1), jnp.float32),
        "bn1_gamma": 1.0 + 0.1 * jax.random.normal(keys[3], (hidden_dim,), jnp.float32),
        "bn1_beta": 0.1 * jax.random.normal(keys[4], (hidden_dim,), jnp.float32),
        "bn1_mean": 0.1 * jax.random.normal(keys[5], (hidden_dim,), jnp.float32),
        "bn1_var": 1.0 + jax.random.uniform(keys[6], (hidden_dim,), jnp.float32),
        "bn2_gamma": 1.0 + 0.1 * jax.random.normal(keys[7], (hidden_dim,), jnp.float32),
        "bn2_beta": 0.1 * jax.random.normal(keys[8], (hidden_dim,), jnp.float32),
        "bn2_mean": jnp.zeros((hidden_dim,), jnp.float32),
        "bn2_var": jnp.ones((hidden_dim,), jnp.float32),
    }

    x = jax.random.normal(keys[9], (batch * num_glance_segments, input_dim), jnp.float32)

    x1, x2 = temporal_policy_forward(x, params, num_glance_segments, temperature)
    jax.block_until_ready((x1, x2))

    r1, r2 = _ref_forward(x, params, num_glance_segments, temperature)
    assert x1.shape == (batch, num_glance_segments) and x2.shape == (batch, num_glance_segments)
    assert jnp.allclose(x1, r1, atol=1e-5), "x1 mismatch vs reference"
    assert jnp.allclose(x2, r2, atol=1e-5), "x2 mismatch vs reference"
    assert jnp.allclose(x1.sum(-1), 1.0, atol=1e-4) and jnp.allclose(x2.sum(-1), 1.0, atol=1e-4)

    print("KERNEL_OK")
</pallas_src>

<mosaic_0001>
module attributes {stable_mosaic.version = 11 : i64} {
  func.func @temporal_policy_kernel(%arg0: i32, %arg1: memref<16x16xf32, #tpu.memory_space<vmem>>, %arg2: memref<48x32xf32, #tpu.memory_space<vmem>>, %arg3: memref<2x32xf32, #tpu.memory_space<vmem>>, %arg4: memref<96x32xf32, #tpu.memory_space<vmem>>, %arg5: memref<32x1xf32, #tpu.memory_space<vmem>>, %arg6: memref<2x8x2xf32, #tpu.memory_space<vmem>>) attributes {dimension_semantics = [#tpu.dimension_semantics<parallel>], iteration_bounds = array<i64: 1>, scalar_prefetch = 0 : i64, scratch_operands = 0 : i64, tpu.core_type = #tpu.core_type<tc>, window_params = [{transform_indices = @transform_0, window_bounds = array<i64: 16, 16>}, {pipeline_mode = #tpu.pipeline_mode<synchronous>, transform_indices = @transform_1, window_bounds = array<i64: 48, 32>}, {pipeline_mode = #tpu.pipeline_mode<synchronous>, transform_indices = @transform_2, window_bounds = array<i64: 2, 32>}, {pipeline_mode = #tpu.pipeline_mode<synchronous>, transform_indices = @transform_3, window_bounds = array<i64: 96, 32>}, {pipeline_mode = #tpu.pipeline_mode<synchronous>, transform_indices = @transform_4, window_bounds = array<i64: 32, 1>}, {transform_indices = @transform_5, window_bounds = array<i64: 2, 8, 2>}]} {
    %c0 = arith.constant 0 : index
    %c0_0 = arith.constant 0 : index
    %0 = vector.load %arg1[%c0, %c0_0] : memref<16x16xf32, #tpu.memory_space<vmem>>, vector<16x16xf32>
    %1 = tpu.iota {dimensions = array<i32: 1>} : vector<2x8x1xi32>
    %c0_i32 = arith.constant 0 : i32
    %2 = vector.broadcast %c0_i32 : i32 to vector<2x8x1xi32>
    %3 = arith.cmpi sgt, %1, %2 : vector<2x8x1xi32>
    %4 = arith.extui %3 : vector<2x8x1xi1> to vector<2x8x1xi32>
    %5 = arith.sitofp %4 : vector<2x8x1xi32> to vector<2x8x1xf32>
    %6 = vector.shape_cast %5 : vector<2x8x1xf32> to vector<16x1xf32>
    %c7_i32 = arith.constant 7 : i32
    %7 = vector.broadcast %c7_i32 : i32 to vector<2x8x1xi32>
    %8 = arith.cmpi slt, %1, %7 : vector<2x8x1xi32>
    %9 = arith.extui %8 : vector<2x8x1xi1> to vector<2x8x1xi32>
    %10 = arith.sitofp %9 : vector<2x8x1xi32> to vector<2x8x1xf32>
    %11 = vector.shape_cast %10 : vector<2x8x1xf32> to vector<16x1xf32>
    %12 = vector.extract_strided_slice %0 {offsets = [15, 0], sizes = [1, 16], strides = [1, 1]} : vector<16x16xf32> to vector<1x16xf32>
    %13 = vector.extract_strided_slice %0 {offsets = [0, 0], sizes = [15, 16], strides = [1, 1]} : vector<16x16xf32> to vector<15x16xf32>
    %14 = tpu.concatenate %12, %13 in 0 : vector<1x16xf32>, vector<15x16xf32> -> vector<16x16xf32>
    %15 = vector.broadcast %6 : vector<16x1xf32> to vector<16x16xf32>
    %16 = arith.mulf %14, %15 : vector<16x16xf32>
    %17 = vector.extract_strided_slice %0 {offsets = [1, 0], sizes = [15, 16], strides = [1, 1]} : vector<16x16xf32> to vector<15x16xf32>
    %18 = vector.extract_strided_slice %0 {offsets = [0, 0], sizes = [1, 16], strides = [1, 1]} : vector<16x16xf32> to vector<1x16xf32>
    %19 = tpu.concatenate %17, %18 in 0 : vector<15x16xf32>, vector<1x16xf32> -> vector<16x16xf32>
    %20 = vector.broadcast %11 : vector<16x1xf32> to vector<16x16xf32>
    %21 = arith.mulf %19, %20 : vector<16x16xf32>
    %22 = tpu.concatenate %16, %0, %21 in 1 : vector<16x16xf32>, vector<16x16xf32>, vector<16x16xf32> -> vector<16x48xf32>
    %c0_1 = arith.constant 0 : index
    %c0_2 = arith.constant 0 : index
    %23 = vector.load %arg2[%c0_1, %c0_2] : memref<48x32xf32, #tpu.memory_space<vmem>>, vector<48x32xf32>
    %cst = arith.constant dense<0.000000e+00> : vector<16x32xf32>
    %24 = tpu.matmul %22, %23, %cst {dimension_numbers = #tpu.dot_dimension_numbers<[1], [0], [0], [1], [0, 0, 1, 1], [], []>} : vector<16x48xf32>, vector<48x32xf32>, vector<16x32xf32> -> vector<16x32xf32>
    %c0_3 = arith.constant 0 : index
    %c0_4 = arith.constant 0 : index
    %25 = vector.load %arg3[%c0_3, %c0_4] : memref<2x32xf32, #tpu.memory_space<vmem>>, vector<1x32xf32>
    %26 = vector.broadcast %25 : vector<1x32xf32> to vector<16x32xf32>
    %27 = arith.addf %24, %26 : vector<16x32xf32>
    %cst_5 = arith.constant 0.000000e+00 : f32
    %28 = vector.broadcast %cst_5 : f32 to vector<16x32xf32>
    %29 = arith.maximumf %27, %28 : vector<16x32xf32>
    %30 = vector.extract_strided_slice %29 {offsets = [15, 0], sizes = [1, 32], strides = [1, 1]} : vector<16x32xf32> to vector<1x32xf32>
    %31 = vector.extract_strided_slice %29 {offsets = [0, 0], sizes = [15, 32], strides = [1, 1]} : vector<16x32xf32> to vector<15x32xf32>
    %32 = tpu.concatenate %30, %31 in 0 : vector<1x32xf32>, vector<15x32xf32> -> vector<16x32xf32>
    %33 = vector.broadcast %6 : vector<16x1xf32> to vector<16x32xf32>
    %34 = arith.mulf %32, %33 : vector<16x32xf32>
    %35 = vector.extract_strided_slice %29 {offsets = [1, 0], sizes = [15, 32], strides = [1, 1]} : vector<16x32xf32> to vector<15x32xf32>
    %36 = vector.extract_strided_slice %29 {offsets = [0, 0], sizes = [1, 32], strides = [1, 1]} : vector<16x32xf32> to vector<1x32xf32>
    %37 = tpu.concatenate %35, %36 in 0 : vector<15x32xf32>, vector<1x32xf32> -> vector<16x32xf32>
    %38 = vector.broadcast %11 : vector<16x1xf32> to vector<16x32xf32>
    %39 = arith.mulf %37, %38 : vector<16x32xf32>
    %40 = tpu.concatenate %34, %29, %39 in 1 : vector<16x32xf32>, vector<16x32xf32>, vector<16x32xf32> -> vector<16x96xf32>
    %c0_6 = arith.constant 0 : index
    %c0_7 = arith.constant 0 : index
    %41 = vector.load %arg4[%c0_6, %c0_7] : memref<96x32xf32, #tpu.memory_space<vmem>>, vector<96x32xf32>
    %cst_8 = arith.constant dense<0.000000e+00> : vector<16x32xf32>
    %42 = tpu.matmul %40, %41, %cst_8 {dimension_numbers = #tpu.dot_dimension_numbers<[1], [0], [0], [1], [0, 0, 1, 1], [], []>} : vector<16x96xf32>, vector<96x32xf32>, vector<16x32xf32> -> vector<16x32xf32>
    %c1 = arith.constant 1 : index
    %c0_9 = arith.constant 0 : index
    %43 = vector.load %arg3[%c1, %c0_9] : memref<2x32xf32, #tpu.memory_space<vmem>>, vector<1x32xf32>
    %44 = vector.broadcast %43 : vector<1x32xf32> to vector<16x32xf32>
    %45 = arith.addf %42, %44 : vector<16x32xf32>
    %cst_10 = arith.constant 0.000000e+00 : f32
    %46 = vector.broadcast %cst_10 : f32 to vector<16x32xf32>
    %47 = arith.maximumf %45, %46 : vector<16x32xf32>
    %c0_11 = arith.constant 0 : index
    %c0_12 = arith.constant 0 : index
    %48 = vector.load %arg5[%c0_11, %c0_12] : memref<32x1xf32, #tpu.memory_space<vmem>>, vector<32x1xf32>
    %cst_13 = arith.constant dense<0.000000e+00> : vector<16x1xf32>
    %49 = tpu.matmul %47, %48, %cst_13 {dimension_numbers = #tpu.dot_dimension_numbers<[1], [0], [0], [1], [0, 0, 1, 1], [], []>} : vector<16x32xf32>, vector<32x1xf32>, vector<16x1xf32> -> vector<16x1xf32>
    %50 = vector.shape_cast %49 : vector<16x1xf32> to vector<2x8x1xf32>
    %cst_14 = arith.constant dense<0xFF800000> : vector<2x1xf32>
    %51 = vector.multi_reduction <maximumf>, %50, %cst_14 [1] : vector<2x8x1xf32> to vector<2x1xf32>
    %52 = vector.shape_cast %51 : vector<2x1xf32> to vector<2x1x1xf32>
    %53 = vector.broadcast %52 : vector<2x1x1xf32> to vector<2x8x1xf32>
    %54 = arith.subf %50, %53 : vector<2x8x1xf32>
    %55 = math.exp %54 : vector<2x8x1xf32>
    %cst_15 = arith.constant dense<0.000000e+00> : vector<2x1xf32>
    %56 = vector.multi_reduction <add>, %55, %cst_15 [1] : vector<2x8x1xf32> to vector<2x1xf32>
    %57 = vector.shape_cast %56 : vector<2x1xf32> to vector<2x1x1xf32>
    %58 = vector.broadcast %57 : vector<2x1x1xf32> to vector<2x8x1xf32>
    %59 = arith.divf %55, %58 : vector<2x8x1xf32>
    %cst_16 = arith.constant 2.500000e-01 : f32
    %60 = vector.broadcast %cst_16 : f32 to vector<2x8x1xf32>
    %61 = arith.mulf %54, %60 : vector<2x8x1xf32>
    %62 = math.exp %61 : vector<2x8x1xf32>
    %cst_17 = arith.constant dense<0.000000e+00> : vector<2x1xf32>
    %63 = vector.multi_reduction <add>, %62, %cst_17 [1] : vector<2x8x1xf32> to vector<2x1xf32>
    %64 = vector.shape_cast %63 : vector<2x1xf32> to vector<2x1x1xf32>
    %65 = vector.broadcast %64 : vector<2x1x1xf32> to vector<2x8x1xf32>
    %66 = arith.divf %62, %65 : vector<2x8x1xf32>
    %67 = tpu.concatenate %59, %66 in 2 : vector<2x8x1xf32>, vector<2x8x1xf32> -> vector<2x8x2xf32>
    %c0_18 = arith.constant 0 : index
    %c0_19 = arith.constant 0 : index
    %c0_20 = arith.constant 0 : index
    %68 = vector.load %arg6[%c0_18, %c0_19, %c0_20] : memref<2x8x2xf32, #tpu.memory_space<vmem>>, vector<2x8x2xf32>
    tpu.vector_store %arg6[%c0_18, %c0_19, %c0_20], %67 {strides = array<i32>} : memref<2x8x2xf32, #tpu.memory_space<vmem>>, vector<2x8x2xf32>,
    return
  }
  func.func @transform_0(%arg0: i32) -> (i32, i32) {
    %c0_i32 = arith.constant 0 : i32
    %c0_i32_0 = arith.constant 0 : i32
    return %arg0, %c0_i32 : i32, i32
  }
  func.func @transform_1(%arg0: i32) -> (i32, i32) {
    %c0_i32 = arith.constant 0 : i32
    %c0_i32_0 = arith.constant 0 : i32
    %c0_i32_1 = arith.constant 0 : i32
    return %c0_i32, %c0_i32_0 : i32, i32
  }
  func.func @transform_2(%arg0: i32) -> (i32, i32) {
    %c0_i32 = arith.constant 0 : i32
    %c0_i32_0 = arith.constant 0 : i32
    %c0_i32_1 = arith.constant 0 : i32
    return %c0_i32, %c0_i32_0 : i32, i32
  }
  func.func @transform_3(%arg0: i32) -> (i32, i32) {
    %c0_i32 = arith.constant 0 : i32
    %c0_i32_0 = arith.constant 0 : i32
    %c0_i32_1 = arith.constant 0 : i32
    return %c0_i32, %c0_i32_0 : i32, i32
  }
  func.func @transform_4(%arg0: i32) -> (i32, i32) {
    %c0_i32 = arith.constant 0 : i32
    %c0_i32_0 = arith.constant 0 : i32
    %c0_i32_1 = arith.constant 0 : i32
    return %c0_i32, %c0_i32_0 : i32, i32
  }
  func.func @transform_5(%arg0: i32) -> (i32, i32, i32) {
    %c0_i32 = arith.constant 0 : i32
    %c0_i32_0 = arith.constant 0 : i32
    %c0_i32_1 = arith.constant 0 : i32
    return %arg0, %c0_i32, %c0_i32_0 : i32, i32, i32
  }
}

</mosaic_0001>

<bundles_post_ra>
// kernel: tpu_custom_call.1
= control target key start
LH: loop header
LB: loop body
LE: loop exit
PB: predicated region body
PF: predicated region fallthrough
CT: control target
= control target key end

     0   :  { %v22_v0 = vlaneseq  ;;  %vm42_vm0 = vcmask 1046528   ;;  %s405_s24 = smov 16   ;;  %v406_v9 = vmov 0.0   ;;  %vm34_vm3 = vcmask 1040384   ;;  %s408_s21 = smov 64   ;;  %s564_s0 = inlined_call_operand.vmem [shape: f32[16,16], index: 0, kind: input, shape index: {}]   ;;  %s565_s1 = inlined_call_operand.vmem [shape: f32[48,32], index: 1, kind: input, shape index: {}]   ;;  %s566_s2 = inlined_call_operand.vmem [shape: f32[2,32], index: 2, kind: input, shape index: {}]   ;;  %s567_s3 = inlined_call_operand.vmem [shape: f32[96,32], index: 3, kind: input, shape index: {}]   ;;  %s568_s4 = inlined_call_operand.vmem [shape: f32[32,1], index: 4, kind: input, shape index: {}]   ;;  %s569_s5 = inlined_call_operand.vmem [shape: f32[2,8,2], index: 5, kind: output, shape index: {}]  }
   0x1   :  { %v20_v1 = vld [vmem:[%s564_s0] sm:$0xff]  ;;  %v21_v2 = vld [vmem:[%s564_s0 + $0x8] sm:$0xff]  ;;  %s407_s0 = smov 32   ;;  %v75_v19 = vld [vmem:[%s565_s1 + $0x18] sm:$0xff]  ;;  %vm66_vm4 = vcmask 130048   ;;  %vm69_vm5 = vcmask 261120  }
   0x2   :  { %v77_v3 = vld [vmem:[%s565_s1 + $0x28] sm:$0xff]  ;;  %52 = vrot.lane.b32.xlu0 %v20_v1, %s405_s24  ;;  %v43_v4 = vrot.slane %v20_v1, 1  ;;  %54 = vrot.lane.b32.xlu1 %v21_v2, %s405_s24  ;;  %v44_v5 = vrot.slane %v21_v2, 1  ;;  %v23_v6 = vshrl.u32 %v22_v0, 7  ;;  %v35_v14 = vrot.slane %v20_v1, 7  ;;  %v76_v17 = vld [vmem:[%s565_s1 + $0x20] sm:$0xff] }
   0x3   :  { %97 = vmatpush.msra.mxu0 %v77_v3  ;;  %v31_v15 = vrot.slane %v21_v2, 7  ;;  %v74_v20 = vld [vmem:[%s565_s1 + $0x10] sm:$0xff]  ;;  %v73_v21 = vld [vmem:[%s565_s1 + $0x8] sm:$0xff]  ;;  %v72_v22 = vld [vmem:[%s565_s1] sm:$0xff]  ;;  %vm80_vm6 = vcmask 392192   ;;  %vm148_vm7 = vcmask 523264  }
   0x4   :  { %v45_v7 = vsel %vm42_vm0, %v43_v4, %v44_v5  ;;  %v49_v8 = vsel %vm42_vm0, %v44_v5, %v43_v4  ;;  %vm24_vm1 = vcmp.gt.s32.totalorder %v23_v6, 0  ;;  %vm27_vm2 = vcmp.lt.s32.totalorder %v23_v6, 7  ;;  %v162_v33 = vld [vmem:[%s567_s3 + $0x58] sm:$0xff]  ;;  %v161_v34 = vld [vmem:[%s567_s3 + $0x50] sm:$0xff]  ;;  %v160_v35 = vld [vmem:[%s567_s3 + $0x48] sm:$0xff] }
   0x5   :  { %v451_v10 = vsel %vm24_vm1, 1.0, %v406_v9  ;;  %v453_v11 = vsel %vm27_vm2, 1.0, %v406_v9  ;;  %v39_v16 = vsel %vm34_vm3, %v31_v15, %v35_v14  ;;  %98 = vmatpush.msra.mxu0 %v76_v17  ;;  %v36_v18 = vsel %vm34_vm3, %v35_v14, %v31_v15  ;;  %176 = vmatpush.msra.mxu1 %v162_v33  ;;  %v159_v36 = vld [vmem:[%s567_s3 + $0x40] sm:$0xff]  ;;  %v158_v37 = vld [vmem:[%s567_s3 + $0x38] sm:$0xff]  ;;  %v157_v55 = vld [vmem:[%s567_s3 + $0x30] sm:$0xff] }
   0x6   :  { %v50_v12 = vmul.f32 %v453_v11, %v45_v7  ;;  %v51_v13 = vmul.f32 %v453_v11, %v49_v8  ;;  %v40_v24 = vmul.f32 %v451_v10, %v39_v16  ;;  %v41_v29 = vmul.f32 %v451_v10, %v36_v18  ;;  %370 = vmatpush.msra.mxu3 %v162_v33  ;;  %v387_v38 = vld [vmem:[%s566_s2] ss:$0 sm:$0xff]  ;;  %v156_v56 = vld [vmem:[%s567_s3 + $0x28] sm:$0xff]  ;;  %v154_v58 = vld [vmem:[%s567_s3 + $0x18] sm:$0xff] }
   0x7   :  { %99 = vmatpush.msra.mxu0 %v75_v19  ;;  %177 = vmatpush.msra.mxu1 %v161_v34  ;;  %v155_v57 = vld [vmem:[%s567_s3 + $0x20] sm:$0xff]  ;;  %v153_v59 = vld [vmem:[%s567_s3 + $0x10] sm:$0xff]  ;;  %v152_v60 = vld [vmem:[%s567_s3 + $0x8] sm:$0xff]  ;;  %vm165_vm8 = vcmask 785408   ;;  %vm230_vm9 = vcmask 7168  }
   0x8   :  { %371 = vmatpush.msra.mxu3 %v161_v34  ;;  %v151_v61 = vld [vmem:[%s567_s3] sm:$0xff]  ;;  %v200_v63 = vld [vmem:[%s568_s4 + $0x18] sm:$0xff]  ;;  %v199_v9 = vld [vmem:[%s568_s4 + $0x10] sm:$0xff] }
   0x9   :  { %100 = vmatpush.msra.mxu0 %v74_v20  ;;  %178 = vmatpush.msra.mxu1 %v160_v35 }
   0xa   :  { %60 = vrot.lane.b32.xlu0 %v50_v12, %s407_s0  ;;  %62 = vrot.lane.b32.xlu1 %v51_v13, %s407_s0  ;;  %v197_v12 = vld [vmem:[%s568_s4] sm:$0xff] }
   0xb   :  { %101 = vmatpush.msra.mxu0 %v73_v21  ;;  %372 = vmatpush.msra.mxu3 %v160_v35 }
   0xc   :  { %179 = vmatpush.msra.mxu1 %v159_v36  ;;  %219 = vmatpush.msra.mxu2 %v200_v63 }
   0xd   :  { %102 = vmatpush.msra.mxu0 %v72_v22  ;;  %373 = vmatpush.msra.mxu3 %v159_v36 }
   0xe   :  { %180 = vmatpush.msra.mxu1 %v158_v37  ;;  %220 = vmatpush.msra.mxu2 %v199_v9 }
   0xf   :  { %374 = vmatpush.msra.mxu3 %v158_v37 }
  0x10   :  { %181 = vmatpush.msra.mxu1 %v157_v55 }
  0x11   :  { %375 = vmatpush.msra.mxu3 %v157_v55 }
  0x12   :  { %182 = vmatpush.msra.mxu1 %v156_v56 }
  0x13   :  { %376 = vmatpush.msra.mxu3 %v156_v56 }
  0x14   :  { %183 = vmatpush.msra.mxu1 %v155_v57 }
  0x15   :  { %377 = vmatpush.msra.mxu3 %v155_v57 }
  0x16   :  { %184 = vmatpush.msra.mxu1 %v154_v58 }
  0x17   :  { %378 = vmatpush.msra.mxu3 %v154_v58 }
  0x18   :  { %185 = vmatpush.msra.mxu1 %v153_v59 }
  0x19   :  { %379 = vmatpush.msra.mxu3 %v153_v59 }
  0x1a   :  { %186 = vmatpush.msra.mxu1 %v152_v60 }
  0x1b   :  { %380 = vmatpush.msra.mxu3 %v152_v60 }
  0x1c   :  { %187 = vmatpush.msra.mxu1 %v151_v61 }
  0x1d   :  { %381 = vmatpush.msra.mxu3 %v151_v61 }
  0x74   :  { %v53_v23 = vpop.permute.xlu0 %52  ;;  %v55_v25 = vpop.permute.xlu1 %54 }
  0x75   :  { %v67_v26 = vsel %vm66_vm4, %v40_v24, %v53_v23  ;;  %v68_v30 = vsel %vm66_vm4, %v41_v29, %v55_v25 }
  0x7c   :  { %v61_v27 = vpop.permute.xlu0 %60  ;;  %v63_v31 = vpop.permute.xlu1 %62 }
  0x7d   :  { %v70_v28 = vsel %vm69_vm5, %v67_v26, %v61_v27  ;;  %v71_v32 = vsel %vm69_vm5, %v68_v30, %v63_v31 }
  0x7e   :  { %364 = vmatmul.msk.f32.vlgmr.msra.gmra.mxu0 %vm80_vm6, %v70_v28 }
  0x86   :  { %365 = vmatmul.msk.f32.gmra.mxu0 %vm80_vm6, %v71_v32  ;;  %vm355_vm6 = vcmask 15360  }
  0xfb   :  { %v104_v39 = vpop.f32.mrf.mxu0 }
  0xfc   :  { %v105_v40 = vadd.f32 %v387_v38, %v104_v39 }
  0xfe   :  { %v110_v41 = vmax.f32 %v105_v40, 0.0 }
 0x100   :  { %132 = vrot.lane.b32.xlu2 %v110_v41, %s407_s0  ;;  %v116_v45 = vrot.slane %v110_v41, 7  ;;  %v123_v46 = vrot.slane %v110_v41, 1 }
 0x103   :  { %v107_v42 = vpop.f32.mrf.mxu0 }
 0x104   :  { %v108_v43 = vadd.f32 %v387_v38, %v107_v42 }
 0x106   :  { %v111_v44 = vmax.f32 %v108_v43, 0.0 }
 0x108   :  { %v113_v47 = vrot.slane %v111_v44, 7  ;;  %v124_v48 = vrot.slane %v111_v44, 1  ;;  %134 = vrot.lane.b32.xlu0 %v111_v44, %s407_s0 }
 0x10a   :  { %v129_v49 = vsel %vm42_vm0, %v124_v48, %v123_v46  ;;  %v125_v50 = vsel %vm42_vm0, %v123_v46, %v124_v48  ;;  %v120_v51 = vsel %vm34_vm3, %v113_v47, %v116_v45  ;;  %v117_v52 = vsel %vm34_vm3, %v116_v45, %v113_v47 }
 0x10b   :  { %v131_v53 = vmul.f32 %v453_v11, %v129_v49  ;;  %v130_v54 = vmul.f32 %v453_v11, %v125_v50  ;;  %v121_v0 = vmul.f32 %v451_v10, %v120_v51  ;;  %v122_v5 = vmul.f32 %v451_v10, %v117_v52  ;;  %v198_v11 = vld [vmem:[%s568_s4 + $0x8] sm:$0xff]  ;;  %v388_v10 = vld [vmem:[%s566_s2 + $0x1] ss:$0 sm:$0xff]  ;;  %s409_s2 = smov 1  }
 0x10c   :  { %221 = vmatpush.msra.mxu2 %v198_v11 }
 0x10d   :  { %142 = vrot.lane.b32.xlu1 %v131_v53, %s408_s21  ;;  %140 = vrot.lane.b32.xlu2 %v130_v54, %s408_s21 }
 0x10e   :  { %222 = vmatpush.msra.mxu2 %v197_v12 }
 0x15a   :  { %v133_v62 = vpop.permute.xlu2 %132 }
 0x15b   :  { %v146_v1 = vsel %vm69_vm5, %v121_v0, %v133_v62 }
 0x167   :  { %v141_v2 = vpop.permute.xlu2 %140 }
 0x168   :  { %v149_v3 = vsel %vm148_vm7, %v146_v1, %v141_v2 }
 0x169   :  { %366 = vmatmul.msk.f32.vlgmr.msra.gmra.mxu1 %vm165_vm8, %v149_v3 }
 0x17a   :  { %v135_v4 = vpop.permute.xlu0 %134 }
 0x17b   :  { %v147_v6 = vsel %vm69_vm5, %v122_v5, %v135_v4 }
 0x17f   :  { %v143_v7 = vpop.permute.xlu1 %142 }
 0x180   :  { %v150_v8 = vsel %vm148_vm7, %v147_v6, %v143_v7 }
 0x181   :  { %367 = vmatmul.msk.f32.vlgmr.msra.gmra.mxu3 %vm165_vm8, %v150_v8 }
 0x1e6   :  { %v189_v13 = vpop.f32.mrf.mxu1 }
 0x1e7   :  { %v190_v14 = vadd.f32 %v388_v10, %v189_v13 }
 0x1e9   :  { %v195_v15 = vmax.f32 %v190_v14, 0.0 }
 0x1eb   :  { %368 = vmatmul.msk.f32.vlgmr.msra.gmra.mxu2 %vm69_vm5, %v195_v15 }
 0x204   :  { %v192_v16 = vpop.f32.mrf.mxu3 }
 0x205   :  { %v193_v17 = vadd.f32 %v388_v10, %v192_v16 }
 0x207   :  { %v196_v18 = vmax.f32 %v193_v17, 0.0 }
 0x209   :  { %369 = vmatmul.msk.f32.gmra.mxu2 %vm69_vm5, %v196_v18 }
 0x26e   :  { %v224_v19 = vpop.f32.mrf.mxu2 }
 0x26f   :  { %v231_v20 = vsel %vm230_vm9, %v224_v19, -inf }
 0x270   :  { %v232_v21 = vrot.slane %v231_v20, 4 }
 0x272   :  { %v233_v22 = vmax.f32 %v231_v20, %v232_v21 }
 0x274   :  { %v234_v23 = vrot.slane %v233_v22, 2 }
 0x276   :  { %v235_v24 = vmax.f32 %v233_v22, %v234_v23 }
 0x278   :  { %v236_v25 = vrot.slane %v235_v24, 1 }
 0x27a   :  { %v237_v26 = vmax.f32 %v235_v24, %v236_v25 }
 0x27c   :  { %v245_v27 = vsub.f32 %v224_v19, %v237_v26 }
 0x27e   :  { %v295_v28 = vmul.f32 0.25, %v245_v27  ;;  %v247_v5 = vmul.f32 1.442695, %v245_v27 }
 0x280   :  { %v297_v29 = vmul.f32 1.442695, %v295_v28 }
 0x282   :  { %389 = vpow2.f32 %v297_v29 }
 0x288   :  { %v390_v30 = vpop.eup %389 }
 0x289   :  { %v301_v31 = vsel %vm230_vm9, %v390_v30, 0.0 }
 0x28a   :  { %v302_v32 = vrot.slane %v301_v31, 4 }
 0x28c   :  { %v303_v33 = vadd.f32 %v302_v32, %v301_v31  ;;  %v227_v34 = vpop.f32.mrf.mxu2 }
 0x28d   :  { %v238_v35 = vsel %vm230_vm9, %v227_v34, -inf }
 0x28e   :  { %v304_v36 = vrot.slane %v303_v33, 2  ;;  %v239_v37 = vrot.slane %v238_v35, 4 }
 0x290   :  { %v305_v38 = vadd.f32 %v304_v36, %v303_v33  ;;  %v240_v39 = vmax.f32 %v238_v35, %v239_v37 }
 0x292   :  { %v306_v40 = vrot.slane %v305_v38, 1  ;;  %v241_v41 = vrot.slane %v240_v39, 2 }
 0x294   :  { %v307_v42 = vadd.f32 %v306_v40, %v305_v38  ;;  %v242_v43 = vmax.f32 %v240_v39, %v241_v41 }
 0x296   :  { %391 = vrcp.f32 %v307_v42  ;;  %v243_v44 = vrot.slane %v242_v43, 1  ;;  %v326_v52 = vand.u32 2147483648, %v307_v42  ;;  %v324_v54 = vand.u32 2147483647, %v307_v42 }
 0x297   :  { %vm320_vm11 = vweird.f32 %v307_v42 }
 0x298   :  { %v244_v45 = vmax.f32 %v242_v43, %v243_v44  ;;  %v327_v56 = vor.u32 1.1754944e-38, %v326_v52  ;;  %vm325_vm13 = vcmp.eq.f32.partialorder %v324_v54, 8.507059e+37 }
 0x29a   :  { %v246_v46 = vsub.f32 %v227_v34, %v244_v45 }
 0x29c   :  { %v392_v47 = vpop.eup %391  ;;  %v296_v48 = vmul.f32 0.25, %v246_v46  ;;  %v249_v27 = vmul.f32 1.442695, %v246_v46 }
 0x29d   :  { %v316_v49 = vmul.f32 %v392_v47, %v307_v42  ;;  %vm321_vm10 = vweird.f32 %v392_v47 }
 0x29e   :  { %v299_v50 = vmul.f32 1.442695, %v296_v48  ;;  %vm322_vm12 = vmor %vm320_vm11, %vm321_vm10 }
 0x29f   :  { %v317_v51 = vsub.f32 1.0, %v316_v49 }
 0x2a0   :  { %393 = vpow2.f32 %v299_v50 }
 0x2a1   :  { %v318_v53 = vmul.f32 %v392_v47, %v317_v51 }
 0x2a3   :  { %v319_v55 = vadd.f32 %v392_v47, %v318_v53 }
 0x2a5   :  { %v323_v57 = vsel %vm322_vm12, %v392_v47, %v319_v55 }
 0x2a6   :  { %v394_v58 = vpop.eup %393  ;;  %v328_v59 = vsel %vm325_vm13, %v327_v56, %v323_v57 }
 0x2a7   :  { %v308_v60 = vsel %vm230_vm9, %v394_v58, 0.0  ;;  %v329_v61 = vmul.f32 %v390_v30, %v328_v59 }
 0x2a8   :  { %v309_v62 = vrot.slane %v308_v60, 4 }
 0x2a9   :  { %347 = vrot.lane.b32.xlu2 %v329_v61, %s409_s2 }
 0x2aa   :  { %v310_v63 = vadd.f32 %v309_v62, %v308_v60 }
 0x2ac   :  { %v311_v0 = vrot.slane %v310_v63, 2 }
 0x2ae   :  { %v312_v1 = vadd.f32 %v311_v0, %v310_v63 }
 0x2b0   :  { %v313_v2 = vrot.slane %v312_v1, 1 }
 0x2b2   :  { %v314_v3 = vadd.f32 %v313_v2, %v312_v1 }
 0x2b4   :  { %395 = vrcp.f32 %v314_v3  ;;  %v341_v8 = vand.u32 2147483648, %v314_v3  ;;  %v339_v11 = vand.u32 2147483647, %v314_v3  ;;  %vm335_vm15 = vweird.f32 %v314_v3 }
 0x2b5   :  { %397 = vpow2.f32 %v247_v5 }
 0x2b6   :  { %v342_v10 = vor.u32 1.1754944e-38, %v341_v8  ;;  %vm340_vm1 = vcmp.eq.f32.partialorder %v339_v11, 8.507059e+37 }
 0x2ba   :  { %v396_v4 = vpop.eup %395 }
 0x2bb   :  { %v331_v6 = vmul.f32 %v396_v4, %v314_v3  ;;  %vm336_vm14 = vweird.f32 %v396_v4  ;;  %v398_v15 = vpop.eup %397 }
 0x2bc   :  { %vm337_vm0 = vmor %vm335_vm15, %vm336_vm14  ;;  %v251_v17 = vsel %vm230_vm9, %v398_v15, 0.0 }
 0x2bd   :  { %v332_v7 = vsub.f32 1.0, %v331_v6  ;;  %v252_v18 = vrot.slane %v251_v17, 4 }
 0x2bf   :  { %v333_v9 = vmul.f32 %v396_v4, %v332_v7  ;;  %v253_v19 = vadd.f32 %v252_v18, %v251_v17 }
 0x2c1   :  { %v334_v12 = vadd.f32 %v396_v4, %v333_v9  ;;  %v254_v20 = vrot.slane %v253_v19, 2 }
 0x2c3   :  { %v338_v13 = vsel %vm337_vm0, %v396_v4, %v334_v12  ;;  %v255_v21 = vadd.f32 %v254_v20, %v253_v19 }
 0x2c4   :  { %v343_v14 = vsel %vm340_vm1, %v342_v10, %v338_v13 }
 0x2c5   :  { %v344_v16 = vmul.f32 %v394_v58, %v343_v14  ;;  %v256_v22 = vrot.slane %v255_v21, 1 }
 0x2c7   :  { %349 = vrot.lane.b32.xlu0 %v344_v16, %s409_s2  ;;  %v257_v23 = vadd.f32 %v256_v22, %v255_v21 }
 0x2c9   :  { %399 = vrcp.f32 %v257_v23  ;;  %v276_v30 = vand.u32 2147483648, %v257_v23  ;;  %vm270_vm3 = vweird.f32 %v257_v23  ;;  %v274_v31 = vand.u32 2147483647, %v257_v23 }
 0x2ca   :  { %401 = vpow2.f32 %v249_v27 }
 0x2cb   :  { %v277_v34 = vor.u32 1.1754944e-38, %v276_v30  ;;  %vm275_vm5 = vcmp.eq.f32.partialorder %v274_v31, 8.507059e+37 }
 0x2cf   :  { %v400_v24 = vpop.eup %399 }
 0x2d0   :  { %v266_v25 = vmul.f32 %v400_v24, %v257_v23  ;;  %vm271_vm2 = vweird.f32 %v400_v24  ;;  %v402_v32 = vpop.eup %401 }
 0x2d1   :  { %vm272_vm4 = vmor %vm270_vm3, %vm271_vm2  ;;  %v258_v35 = vsel %vm230_vm9, %v402_v32, 0.0 }
 0x2d2   :  { %v267_v26 = vsub.f32 1.0, %v266_v25  ;;  %v259_v37 = vrot.slane %v258_v35, 4 }
 0x2d4   :  { %v268_v28 = vmul.f32 %v400_v24, %v267_v26  ;;  %v260_v41 = vadd.f32 %v259_v37, %v258_v35 }
 0x2d6   :  { %v269_v29 = vadd.f32 %v400_v24, %v268_v28  ;;  %v261_v42 = vrot.slane %v260_v41, 2 }
 0x2d8   :  { %v273_v33 = vsel %vm272_vm4, %v400_v24, %v269_v29  ;;  %v262_v43 = vadd.f32 %v261_v42, %v260_v41 }
 0x2d9   :  { %v278_v36 = vsel %vm275_vm5, %v277_v34, %v273_v33 }
 0x2da   :  { %v279_v38 = vmul.f32 %v398_v15, %v278_v36  ;;  %v263_v44 = vrot.slane %v262_v43, 1 }
 0x2dc   :  { %v264_v45 = vadd.f32 %v263_v44, %v262_v43 }
 0x2de   :  { %403 = vrcp.f32 %v264_v45  ;;  %v291_v51 = vand.u32 2147483648, %v264_v45  ;;  %vm285_vm8 = vweird.f32 %v264_v45  ;;  %v289_v52 = vand.u32 2147483647, %v264_v45 }
 0x2e0   :  { %v292_v54 = vor.u32 1.1754944e-38, %v291_v51  ;;  %vm290_vm11 = vcmp.eq.f32.partialorder %v289_v52, 8.507059e+37 }
 0x2e4   :  { %v404_v46 = vpop.eup %403 }
 0x2e5   :  { %v281_v47 = vmul.f32 %v404_v46, %v264_v45  ;;  %vm286_vm7 = vweird.f32 %v404_v46 }
 0x2e6   :  { %vm287_vm10 = vmor %vm285_vm8, %vm286_vm7 }
 0x2e7   :  { %v282_v48 = vsub.f32 1.0, %v281_v47 }
 0x2e9   :  { %v283_v49 = vmul.f32 %v404_v46, %v282_v48 }
 0x2eb   :  { %v284_v50 = vadd.f32 %v404_v46, %v283_v49 }
 0x2ed   :  { %v288_v53 = vsel %vm287_vm10, %v404_v46, %v284_v50 }
 0x2ee   :  { %v293_v55 = vsel %vm290_vm11, %v292_v54, %v288_v53 }
 0x2ef   :  { %v294_v56 = vmul.f32 %v402_v32, %v293_v55 }
 0x303   :  { %v348_v39 = vpop.permute.xlu2 %347 }
 0x304   :  { %v353_v40 = vsel %vm230_vm9, %v279_v38, %v348_v39 }
 0x305   :  { %356 = vst.msk [vmem:[%s569_s5] sm:$0xff] %vm355_vm6, %v353_v40 }
 0x339   :  { %v350_v57 = vpop.permute.xlu0 %349 }
 0x33a   :  { %v354_v58 = vsel %vm230_vm9, %v294_v56, %v350_v57 }
 0x33b   :  { %357 = vst.msk [vmem:[%s569_s5 + $0x8] sm:$0xff] %vm355_vm6, %v354_v58 }

</bundles_post_ra>
